<compile_context>
chip_gen: v5e
topology: v5e:2x2
jax: 0.10.0
libtpu: 0.0.40
codegen_flags: <defaults>
</compile_context>

<pallas_src>
import jax
import jax.numpy as jnp
from jax import lax
from jax.experimental import pallas as pl
from jax.experimental.pallas import tpu as pltpu


def _inference_kernel(x_ref, lbl_ref, wt_ref, b_ref, pred_ref, lblhot_ref):
    # x_ref:      (C, TS)  float32   voxel features (voxels on lanes)
    # lbl_ref:    (1, TS)  int32     integer labels
    # wt_ref:     (K, C)   float32   segmentation-head weight (transposed, resident)
    # b_ref:      (K, 1)   float32   segmentation-head bias (resident)
    # pred_ref:   (K, TS)  bf16      one-hot(argmax(logits))
    # lblhot_ref: (K, TS)  bf16      one-hot(label)
    x = x_ref[...]
    wt = wt_ref[...]
    b = b_ref[...]

    # --- model forward: per-voxel linear head.  (K,C)@(C,TS) on the MXU; with
    # C=K=4 the MXU is ~3% utilized but it is not the bottleneck (HBM-bound).
    logits = jnp.dot(wt, x, preferred_element_type=jnp.float32) + b  # (K, TS)

    k, ts = logits.shape
    row = lax.broadcasted_iota(jnp.int32, (k, ts), 0)  # class index per sublane row

    # --- post_pred: AsDiscrete(argmax=True, to_onehot=K) ---
    # argmax over the (small, dense) class/sublane axis with first-index
    # tie-breaking: max + masked min-index.  Reductions are over K=4 sublanes
    # of fully lane-dense vregs, so they are cheap.
    m = jnp.max(logits, axis=0, keepdims=True)                              # (1, TS)
    amax = jnp.min(jnp.where(logits == m, row, k), axis=0, keepdims=True)   # (1, TS)
    pred_ref[...] = (row == amax).astype(pred_ref.dtype)

    # --- post_label: AsDiscrete(to_onehot=K) ---
    # NOTE: labels outside [0, K) produce an all-zero one-hot row (same as
    # jax.nn.one_hot); MONAI AsDiscrete assumes valid labels.
    lblhot_ref[...] = (row == lbl_ref[...]).astype(lblhot_ref.dtype)


def _round_up(n, m):
    return ((n + m - 1) // m) * m


def inference_mode_forward(x_ncdhw, labels_ncdhw, w, b, *,
                           max_tile_voxels=64 * 1024,
                           out_dtype=jnp.bfloat16):
    """Fused (forward + post_pred + post_label) inference.

    x_ncdhw:      [B, C_in, D, H, W] float32  (PyTorch NCDHW convention)
    labels_ncdhw: [B, 1,    D, H, W] int      labels in [0, K)
    w:            [C_in, K] float32
    b:            [K]       float32
    Returns: (pred_onehot [B, K, D, H, W], label_onehot [B, K, D, H, W]),
             one-hot values in `out_dtype` (0/1 are exact in bf16).
    """
    B, C, D, H, W = x_ncdhw.shape
    K = w.shape[1]
    S = D * H * W

    # Tile the flattened spatial axis.  64K voxels/tile keeps the
    # double-buffered VMEM footprint (~4.5 MiB) well inside v5e's 16 MiB
    # default scoped VMEM while sitting near the HBM roofline on v6e/v7x.
    lane = 128
    max_tile_voxels = max(lane, (max_tile_voxels // lane) * lane)
    if S <= max_tile_voxels:
        tile_s = _round_up(S, lane)
    else:
        tile_s = max_tile_voxels
    s_pad = _round_up(S, tile_s)

    # Channels-first, spatially flattened: pure reshape, no transpose pass.
    x_flat = x_ncdhw.reshape(B, C, S)
    lbl_flat = labels_ncdhw.reshape(B, 1, S).astype(jnp.int32)
    if s_pad != S:
        pad = s_pad - S
        x_flat = jnp.pad(x_flat, ((0, 0), (0, 0), (0, pad)))
        lbl_flat = jnp.pad(lbl_flat, ((0, 0), (0, 0), (0, pad)))

    wt = jnp.asarray(w, jnp.float32).T            # (K, C)
    b2 = jnp.asarray(b, jnp.float32).reshape(K, 1)

    grid = (B, s_pad // tile_s)

    pred_flat, lblhot_flat = pl.pallas_call(
        _inference_kernel,
        out_shape=(
            jax.ShapeDtypeStruct((B, K, s_pad), out_dtype),
            jax.ShapeDtypeStruct((B, K, s_pad), out_dtype),
        ),
        grid_spec=pltpu.PrefetchScalarGridSpec(
            num_scalar_prefetch=0,
            grid=grid,
            in_specs=[
                # voxel feature tile (batch dim squeezed out of the kernel view)
                pl.BlockSpec((None, C, tile_s), lambda bi, si: (bi, 0, si)),
                # label tile
                pl.BlockSpec((None, 1, tile_s), lambda bi, si: (bi, 0, si)),
                # weight / bias: constant block index -> fetched once, stays resident
                pl.BlockSpec((K, C), lambda bi, si: (0, 0)),
                pl.BlockSpec((K, 1), lambda bi, si: (0, 0)),
            ],
            out_specs=[
                pl.BlockSpec((None, K, tile_s), lambda bi, si: (bi, 0, si)),
                pl.BlockSpec((None, K, tile_s), lambda bi, si: (bi, 0, si)),
            ],
        ),
        compiler_params=pltpu.CompilerParams(
            # Both grid axes are independent -> megacore (v7x 2xTC) can split them.
            dimension_semantics=("parallel", "parallel"),
        ),
    )(x_flat, lbl_flat, wt, b2)

    pred = pred_flat[:, :, :S].reshape(B, K, D, H, W)
    lblhot = lblhot_flat[:, :, :S].reshape(B, K, D, H, W)
    return pred, lblhot


if __name__ == "__main__":
    key = jax.random.PRNGKey(0)
    k_x, k_l, k_w, k_b = jax.random.split(key, 4)

    B, C_in, D, H, W = 2, 4, 8, 8, 8   # small synthetic "validation volume"
    K = 4                              # to_onehot classes

    x = jax.random.normal(k_x, (B, C_in, D, H, W), dtype=jnp.float32)
    labels = jax.random.randint(k_l, (B, 1, D, H, W), 0, K, dtype=jnp.int32)

    # Deterministic synthetic segmentation-head parameters (the "model").
    w = jax.random.normal(k_w, (C_in, K), dtype=jnp.float32) * 0.5
    b = jax.random.normal(k_b, (K,), dtype=jnp.float32) * 0.1

    pred_onehot, label_onehot = inference_mode_forward(x, labels, w, b)
    jax.block_until_ready((pred_onehot, label_onehot))

    # Lightweight sanity check against plain JAX reference.
    logits_ref = jnp.einsum("bcdhw,ck->bkdhw", x, w) + b[None, :, None, None, None]
    pred_ref = jax.nn.one_hot(jnp.argmax(logits_ref, axis=1), K, axis=1, dtype=jnp.float32)
    lbl_ref = jax.nn.one_hot(labels[:, 0], K, axis=1, dtype=jnp.float32)
    assert jnp.allclose(pred_onehot.astype(jnp.float32), pred_ref)
    assert jnp.allclose(label_onehot.astype(jnp.float32), lbl_ref)

    print("KERNEL_OK")
</pallas_src>

<mosaic_0001>
module attributes {stable_mosaic.version = 11 : i64} {
  func.func @_inference_kernel(%arg0: i32, %arg1: i32, %arg2: memref<1x4x512xf32, #tpu.memory_space<vmem>>, %arg3: memref<1x1x512xi32, #tpu.memory_space<vmem>>, %arg4: memref<4x4xf32, #tpu.memory_space<vmem>>, %arg5: memref<4x1xf32, #tpu.memory_space<vmem>>, %arg6: memref<1x4x512xbf16, #tpu.memory_space<vmem>>, %arg7: memref<1x4x512xbf16, #tpu.memory_space<vmem>>) attributes {dimension_semantics = [#tpu.dimension_semantics<parallel>, #tpu.dimension_semantics<parallel>], iteration_bounds = array<i64: 2, 1>, scalar_prefetch = 0 : i64, scratch_operands = 0 : i64, tpu.core_type = #tpu.core_type<tc>, window_params = [{transform_indices = @transform_0, window_bounds = array<i64: 1, 4, 512>}, {transform_indices = @transform_1, window_bounds = array<i64: 1, 1, 512>}, {pipeline_mode = #tpu.pipeline_mode<synchronous>, transform_indices = @transform_2, window_bounds = array<i64: 4, 4>}, {pipeline_mode = #tpu.pipeline_mode<synchronous>, transform_indices = @transform_3, window_bounds = array<i64: 4, 1>}, {transform_indices = @transform_4, window_bounds = array<i64: 1, 4, 512>}, {transform_indices = @transform_5, window_bounds = array<i64: 1, 4, 512>}]} {
    %c0 = arith.constant 0 : index
    %c0_0 = arith.constant 0 : index
    %c0_1 = arith.constant 0 : index
    %0 = vector.load %arg2[%c0, %c0_0, %c0_1] : memref<1x4x512xf32, #tpu.memory_space<vmem>>, vector<1x4x512xf32>
    %1 = vector.shape_cast %0 : vector<1x4x512xf32> to vector<4x512xf32>
    %c0_2 = arith.constant 0 : index
    %c0_3 = arith.constant 0 : index
    %2 = vector.load %arg4[%c0_2, %c0_3] : memref<4x4xf32, #tpu.memory_space<vmem>>, vector<4x4xf32>
    %c0_4 = arith.constant 0 : index
    %c0_5 = arith.constant 0 : index
    %3 = vector.load %arg5[%c0_4, %c0_5] : memref<4x1xf32, #tpu.memory_space<vmem>>, vector<4x1xf32>
    %cst = arith.constant dense<0.000000e+00> : vector<4x512xf32>
    %4 = tpu.matmul %2, %1, %cst {dimension_numbers = #tpu.dot_dimension_numbers<[1], [0], [0], [1], [0, 0, 1, 1], [], []>} : vector<4x4xf32>, vector<4x512xf32>, vector<4x512xf32> -> vector<4x512xf32>
    %5 = vector.broadcast %3 : vector<4x1xf32> to vector<4x512xf32>
    %6 = arith.addf %4, %5 : vector<4x512xf32>
    %7 = tpu.iota {dimensions = array<i32: 0>} : vector<4x512xi32>
    %cst_6 = arith.constant dense<0xFF800000> : vector<512xf32>
    %8 = vector.multi_reduction <maximumf>, %6, %cst_6 [0] : vector<4x512xf32> to vector<512xf32>
    %9 = vector.shape_cast %8 : vector<512xf32> to vector<1x512xf32>
    %10 = vector.broadcast %9 : vector<1x512xf32> to vector<4x512xf32>
    %11 = arith.cmpf oeq, %6, %10 : vector<4x512xf32>
    %c4_i32 = arith.constant 4 : i32
    %12 = vector.broadcast %c4_i32 : i32 to vector<4x512xi32>
    %13 = arith.select %11, %7, %12 : vector<4x512xi1>, vector<4x512xi32>
    %cst_7 = arith.constant dense<2147483647> : vector<512xi32>
    %14 = vector.multi_reduction <minsi>, %13, %cst_7 [0] : vector<4x512xi32> to vector<512xi32>
    %15 = vector.shape_cast %14 : vector<512xi32> to vector<1x512xi32>
    %16 = vector.broadcast %15 : vector<1x512xi32> to vector<4x512xi32>
    %17 = arith.cmpi eq, %7, %16 : vector<4x512xi32>
    %18 = arith.extui %17 : vector<4x512xi1> to vector<4x512xi32>
    %19 = arith.sitofp %18 : vector<4x512xi32> to vector<4x512xf32>
    %20 = arith.truncf %19 : vector<4x512xf32> to vector<4x512xbf16>
    %c0_8 = arith.constant 0 : index
    %c0_9 = arith.constant 0 : index
    %c0_10 = arith.constant 0 : index
    %21 = vector.load %arg6[%c0_8, %c0_9, %c0_10] : memref<1x4x512xbf16, #tpu.memory_space<vmem>>, vector<1x4x512xbf16>
    %22 = vector.shape_cast %21 : vector<1x4x512xbf16> to vector<4x512xbf16>
    %23 = vector.shape_cast %20 : vector<4x512xbf16> to vector<1x4x512xbf16>
    tpu.vector_store %arg6[%c0_8, %c0_9, %c0_10], %23 {strides = array<i32>} : memref<1x4x512xbf16, #tpu.memory_space<vmem>>, vector<1x4x512xbf16>,
    %c0_11 = arith.constant 0 : index
    %c0_12 = arith.constant 0 : index
    %c0_13 = arith.constant 0 : index
    %24 = vector.load %arg3[%c0_11, %c0_12, %c0_13] : memref<1x1x512xi32, #tpu.memory_space<vmem>>, vector<1x1x512xi32>
    %25 = vector.shape_cast %24 : vector<1x1x512xi32> to vector<1x512xi32>
    %26 = vector.broadcast %25 : vector<1x512xi32> to vector<4x512xi32>
    %27 = arith.cmpi eq, %7, %26 : vector<4x512xi32>
    %28 = arith.extui %27 : vector<4x512xi1> to vector<4x512xi32>
    %29 = arith.sitofp %28 : vector<4x512xi32> to vector<4x512xf32>
    %30 = arith.truncf %29 : vector<4x512xf32> to vector<4x512xbf16>
    %c0_14 = arith.constant 0 : index
    %c0_15 = arith.constant 0 : index
    %c0_16 = arith.constant 0 : index
    %31 = vector.load %arg7[%c0_14, %c0_15, %c0_16] : memref<1x4x512xbf16, #tpu.memory_space<vmem>>, vector<1x4x512xbf16>
    %32 = vector.shape_cast %31 : vector<1x4x512xbf16> to vector<4x512xbf16>
    %33 = vector.shape_cast %30 : vector<4x512xbf16> to vector<1x4x512xbf16>
    tpu.vector_store %arg7[%c0_14, %c0_15, %c0_16], %33 {strides = array<i32>} : memref<1x4x512xbf16, #tpu.memory_space<vmem>>, vector<1x4x512xbf16>,
    return
  }
  func.func @transform_0(%arg0: i32, %arg1: i32) -> (i32, i32, i32) {
    %c0_i32 = arith.constant 0 : i32
    %c0_i32_0 = arith.constant 0 : i32
    return %arg0, %c0_i32, %arg1 : i32, i32, i32
  }
  func.func @transform_1(%arg0: i32, %arg1: i32) -> (i32, i32, i32) {
    %c0_i32 = arith.constant 0 : i32
    %c0_i32_0 = arith.constant 0 : i32
    return %arg0, %c0_i32, %arg1 : i32, i32, i32
  }
  func.func @transform_2(%arg0: i32, %arg1: i32) -> (i32, i32) {
    %c0_i32 = arith.constant 0 : i32
    %c0_i32_0 = arith.constant 0 : i32
    %c0_i32_1 = arith.constant 0 : i32
    return %c0_i32, %c0_i32_0 : i32, i32
  }
  func.func @transform_3(%arg0: i32, %arg1: i32) -> (i32, i32) {
    %c0_i32 = arith.constant 0 : i32
    %c0_i32_0 = arith.constant 0 : i32
    %c0_i32_1 = arith.constant 0 : i32
    return %c0_i32, %c0_i32_0 : i32, i32
  }
  func.func @transform_4(%arg0: i32, %arg1: i32) -> (i32, i32, i32) {
    %c0_i32 = arith.constant 0 : i32
    %c0_i32_0 = arith.constant 0 : i32
    return %arg0, %c0_i32, %arg1 : i32, i32, i32
  }
  func.func @transform_5(%arg0: i32, %arg1: i32) -> (i32, i32, i32) {
    %c0_i32 = arith.constant 0 : i32
    %c0_i32_0 = arith.constant 0 : i32
    return %arg0, %c0_i32, %arg1 : i32, i32, i32
  }
}

</mosaic_0001>

<bundles_post_ra>
// kernel: tpu_custom_call.1
= control target key start
LH: loop header
LB: loop body
LE: loop exit
PB: predicated region body
PF: predicated region fallthrough
CT: control target
= control target key end

     0   :  { %s1313_s0 = inlined_call_operand.hbm [shape: f32[2,4,512], index: 0, kind: input, shape index: {}]   ;;  %s1314_s1 = inlined_call_operand.hbm [shape: s32[2,1,512], index: 1, kind: input, shape index: {}]   ;;  %s1315_s2 = inlined_call_operand.vmem [shape: f32[4,4], index: 2, kind: input, shape index: {}]   ;;  %s1316_s3 = inlined_call_operand.vmem [shape: f32[4,1], index: 3, kind: input, shape index: {}]   ;;  %s1317_s4 = inlined_call_operand.hbm [shape: bf16[2,4,512], index: 4, kind: output, shape index: {0}]   ;;  %s1318_s5 = inlined_call_operand.hbm [shape: bf16[2,4,512], index: 5, kind: output, shape index: {1}]  }
   0x1   :  { %1319 = sst [smem:[#allocation14_spill]] %s1313_s0 }
   0x2   :  { %11 = vsyncpa [#allocation3], 0 }
   0x3   :  { %13 = vsyncpa [#allocation3 + $0x1], 0 }
   0x4   :  { %14 = vsyncpa [#allocation6], 0 }
   0x5   :  { %16 = vsyncpa [#allocation6 + $0x1], 0 }
   0x6   :  { %17 = vsyncpa [#allocation4], 0 }
   0x7   :  { %19 = vsyncpa [#allocation4 + $0x1], 0 }
   0x8   :  { %20 = vsyncpa [#allocation9], 0 }
   0x9   :  { %22 = vsyncpa [#allocation9 + $0x1], 0  ;;  %s1087_s18 = smov 0   ;;  %s1089_s19 = smov 0  }
   0xa   :  { %s1091_s20 = smov 0   ;;  %s1093_s21 = smov 0  }
   0xb   :  { %s1095_s22 = smov 0   ;;  %s1097_s23 = smov 0  }
   0xc LB: > { %s759_s24 = sadd.s32 4294967295, %s1053_s23   ;;  %s760_s25 = sadd.s32 4294967294, %s1053_s23   ;;  %s1053_s23 = sphi %s1097_s23, %s28_s23   ;;  %s1049_s22 = sphi %s1095_s22, %s1330_s22   ;;  %s1045_s21 = sphi %s1093_s21, %s1329_s21   ;;  %s1041_s20 = sphi %s1091_s20, %s1328_s20   ;;  %s1037_s19 = sphi %s1089_s19, %s1327_s19   ;;  %s1033_s18 = sphi %s1087_s18, %s1326_s18  }
   0xd   : > { %s40_s26 = sadd.s32 1, %s1049_s22  ;;  %s49_s27 = sadd.s32 1, %s1041_s20 }
   0xe   : > { %p42_p0 = scmp.ge.s32.totalorder %s40_s26, 2  ;;  %p56_p1 = scmp.ne.s32.totalorder %s1041_s20, %s1037_s19 }
   0xf   : > { %p57_p2 = scmp.eq.s32.totalorder %s1053_s23, 0  ;;  %p62_p3 = scmp.ne.s32.totalorder %s1037_s19, %s1033_s18 }
  0x10   : > { %s1332_s26 = smov (%p42_p0, %s40_s26), 0  ;;  %p63_p5 = scmp.eq.s32.totalorder %s759_s24, 0 }
  0x11   : > { %p1128_p4 = por %p57_p2, %p56_p1  ;;  %s44_s29 = ssub.s32 %s1049_s22, %s1332_s26 }
  0x12   : > { %p158_p6 = scmp.eq.s32.totalorder %s759_s24, 1  ;;  %p47_p7 = scmp.eq.s32.totalorder %s44_s29, 0 }
  0x13   : > { %p1134_p8 = por %p63_p5, %p62_p3  ;;  %p164_p10 = scmp.eq.s32.totalorder %s760_s25, 1 }
  0x14   : > { %p1138_p9 = por %p158_p6, %p56_p1  ;;  %p762_p12 = scmp.ge.s32.totalorder %s1053_s23, 2 }
  0x15   : > { %s1143_s7 = scalar_select %p47_p7, %s1041_s20, %s49_s27  }
  0x16   : > { %p1145_p11 = por %p164_p10, %p62_p3  ;;  %p822_p13 = scmp.lt.s32.totalorder %s1053_s23, 2 }
  0x17   : > { %s218_s9 = sand.u32 1, %s1041_s20   ;;  %s797_s11 = sshll.u32 %s1049_s22, 4 }
  0x18   : > { %s763_s10 = sshll.u32 %s218_s9, 4  ;;  %s1324_s0 = sld [smem:[#allocation14_spill]] }
  0x19   : > { %s222_s15 = scalar_lea.vmem [#allocation2], %s763_s10  ;;  %p1158_p0 = pnand %p822_p13, %p1128_p4 }
  0x1a   : > { %s233_s16 = sshll.u32 %s222_s15, 4  ;;  %p768_p1 = scmp.ge.s32.totalorder %s1053_s23, 1  ;;  %s234_s16 = int_to_ptr.vmem [resolvable:$true] %s233_s16 }
  0x1b   : > { %p259_p2 = scmp.lt.s32.totalorder %s1053_s23, 3  ;;  %s219_s25 = scalar_lea.sflag [#allocation3], %s218_s9 }
  0x1c   : > { %s766_s27 = sshll.u32 %s218_s9, 2  ;;  %s767_s29 = sshll.u32 %s1049_s22, 2 }
  0x1d   : > { %p260_p3 = pnand %p768_p1, %p259_p2  ;;  %s250_s12 = scalar_lea.hbm %s1314_s1, %s767_s29 }
  0x1e   : > { %s229_s14 = scalar_lea.hbm %s1324_s0, %s797_s11  ;;  %s244_s13 = scalar_lea.vmem [#allocation5], %s766_s27 }
  0x1f   : > { %s231_s17 = sshll.u32 %s229_s14, 4  ;;  %s254_s28 = sshll.u32 %s244_s13, 4  ;;  %s232_s17 = int_to_ptr.hbm [resolvable:$true] %s231_s17  ;;  %s255_s28 = int_to_ptr.vmem [resolvable:$true] %s254_s28 }
  0x20   : > { %811 = dma.hbm_to_vmem [thread:$0]  (!%p1158_p0), %s232_s17, 256, %s234_s16, %s219_s25  }
  0x21   : > { %s252_s14 = sshll.u32 %s250_s12, 4  ;;  %s241_s15 = scalar_lea.sflag [#allocation6], %s218_s9  ;;  %s253_s14 = int_to_ptr.hbm [resolvable:$true] %s252_s14 }
  0x22   : > { %814 = dma.hbm_to_vmem [thread:$0]  (!%p1158_p0), %s253_s14, 64, %s255_s28, %s241_s15  }
  0x23   : > { %263 = sbr.rel (%p260_p3) target bundleno = 230 (0xe6), region = 36  ;;  %s1173_s0 = sand.u32 (!%p260_p3), 1, %s1037_s19  }
  0x24   : > { %s769_s16 = sshll.u32 (!%p260_p3), %s1173_s0, 4  ;;  %s266_s17 = scalar_lea.sflag (!%p260_p3), [#allocation3], %s1173_s0 }
  0x25   : > { %s269_s25 = scalar_lea.vmem (!%p260_p3), [#allocation2], %s769_s16 }
  0x28   : > { %1016 = dma.done.wait (%p1134_p8), %s266_s17, 256  }
  0x29   : > { %1018 = vsyncadd (%p1134_p8), %s266_s17, 4294967040  ;;  %s770_s9 = sshll.u32 %s1173_s0, 2  ;;  %s276_s24 = scalar_lea.sflag [#allocation6], %s1173_s0 }
  0x2a   : > { %s1183_s27 = scalar_lea.vmem [#allocation5], %s770_s9 }
  0x2b   : > { %1020 = dma.done.wait (%p1134_p8), %s276_s24, 64  }
  0x2c   : > { %1022 = vsyncadd (%p1134_p8), %s276_s24, 4294967232  ;;  %v1055_v0 = vmov 0   ;;  %v321_v1 = vld [vmem:[%s269_s25] sm:$0xff]  ;;  %v322_v2 = vld [vmem:[%s269_s25 + $0x8] sm:$0xff]  ;;  %vm343_vm0 = vcmask 1043456   ;;  %vm339_vm1 = vcmask 31744   ;;  %v432_v10 = vlaneseq }
  0x2d   : > { %874 = vset.pattern.permute.xlu0 %v1055_v0  ;;  %332 = vst [vmem:[#allocation1] ss:$2 sm:$0xff] %v321_v1  ;;  %v324_v3 = vld [vmem:[%s1316_s3] sm:$0xf]  ;;  %v540_v18 = vld [vmem:[%s1183_s27] sm:$0xf] }
  0x2e   : > { %334 = vst [vmem:[#allocation1 + $0x10] ss:$2 sm:$0xff] %v322_v2  ;;  %327 = vperm.xlu0 %874, %v324_v3   ;;  %v323_v4 = vld [vmem:[%s1315_s2] sm:$0xf]  ;;  %v1203_v15 = vshrl.u32 %v432_v10, 7  ;;  %v541_v21 = vperm.slane %v540_v18, 0 }
  0x2f   : > { %v542_v22 = vperm.slane %v540_v18, 1  ;;  %v543_v23 = vperm.slane %v540_v18, 2  ;;  %v544_v24 = vperm.slane %v540_v18, 3  ;;  %s771_s30 = sshll.u32 %s1173_s0, 3  ;;  %s798_s13 = sshll.u32 %s1045_s21, 3  ;;  %v1056_v29 = vmov 0.0  }
  0x30   : > { %vm545_vm2 = vcmp.eq.s32.totalorder %v1203_v15, %v541_v21  ;;  %s609_s15 = scalar_lea.hbm %s1318_s5, %s798_s13  ;;  %vm529_vm6 = vcmask 1041408   ;;  %vm533_vm7 = vcmask 1045508   ;;  %s316_s16 = scalar_lea.vmem [#allocation8], %s771_s30 }
  0x31   : > { %vm546_vm3 = vcmp.eq.s32.totalorder %v1203_v15, %v542_v22  ;;  %vm547_vm4 = vcmp.eq.s32.totalorder %v1203_v15, %v543_v23  ;;  %vm548_vm5 = vcmp.eq.s32.totalorder %v1203_v15, %v544_v24  ;;  %v785_v30 = vsel %vm545_vm2, 1.0, %v1056_v29  ;;  %s611_s17 = sshll.u32 %s316_s16, 4  ;;  %s613_s25 = sshll.u32 %s609_s15, 4  ;;  %s612_s17 = int_to_ptr.vmem [resolvable:$true] %s611_s17  ;;  %s614_s25 = int_to_ptr.hbm [resolvable:$true] %s613_s25 }
  0x32   : > { %v786_v31 = vsel %vm546_vm3, 1.0, %v1056_v29  ;;  %v787_v36 = vsel %vm547_vm4, 1.0, %v1056_v29  ;;  %v788_v37 = vsel %vm548_vm5, 1.0, %v1056_v29  ;;  %s579_s9 = scalar_lea.sflag [#allocation9], %s1173_s0  ;;  %s949_s24 = sshra.s32 %s614_s25, 4  ;;  %s950_s24 = int_to_ptr.hbm [resolvable:$true] %s949_s24 }
  0x33   : > { %v557_v38 = vpack.c.bf16 %v786_v31, %v785_v30  ;;  %v558_v45 = vpack.c.bf16 %v788_v37, %v787_v36  ;;  %s951_s27 = scalar_lea.hbm %s950_s24, 8  ;;  %s955_s11 = scalar_lea.hbm %s1318_s5, 16 }
  0x34   : > { %v335_v5 = vld.sshfl [vmem:[#allocation1] sm:$0xff pattern:$0x75316420]  ;;  %v336_v6 = vld.sshfl [vmem:[#allocation1 + $0x8] sm:$0xff pattern:$0x75316420]  ;;  %p952_p4 = scmp.ne.s32.totalorder %s950_s24, %s951_s27  ;;  %p956_p7 = scmp.lt.s32.totalorder %s950_s24, %s1318_s5 }
  0x35   : > { %773 = vmatpush.msk.msra.mxu0 %vm343_vm0, %v335_v5  ;;  %775 = vmatpush.msk.msra.mxu1 %vm343_vm0, %v336_v6  ;;  %v337_v7 = vld.sshfl [vmem:[#allocation1 + $0x10] sm:$0xff pattern:$0x75316420]  ;;  %v338_v8 = vld.sshfl [vmem:[#allocation1 + $0x18] sm:$0xff pattern:$0x75316420]  ;;  %p957_p8 = scmp.lt.s32.totalorder %s955_s11, %s951_s27 }
  0x36   : > { %777 = vmatpush.msk.msra.mxu2 %vm343_vm0, %v337_v7  ;;  %779 = vmatpush.msk.msra.mxu3 %vm343_vm0, %v338_v8  ;;  %v561_v48 = vrot.slane %v557_v38, 2  ;;  %v562_v51 = vrot.slane %v558_v45, 4  ;;  %v563_v52 = vrot.slane %v558_v45, 6  ;;  %p953_p5 = pnand %p952_p4, %p1138_p9 }
  0x37   : > { %774 = vmatmul.msk.f32.vlgmr.msra.gmra.mxu0 %vm339_vm1, %v323_v4  ;;  %776 = vmatmul.msk.f32.vlgmr.msra.gmra.mxu1 %vm339_vm1, %v323_v4  ;;  %p958_p10 = por %p957_p8, %p956_p7 }
  0x38   : > { %778 = vmatmul.msk.f32.vlgmr.msra.gmra.mxu2 %vm339_vm1, %v323_v4  ;;  %780 = vmatmul.msk.f32.vlgmr.msra.gmra.mxu3 %vm339_vm1, %v323_v4  ;;  %v566_v55 = vsel %vm529_vm6, %v557_v38, %v561_v48  ;;  %v569_v58 = vsel %vm533_vm7, %v562_v51, %v563_v52  ;;  %p954_p6 = pneg %p953_p5 }
  0x39   : > { %v570_v59 = vsel %vm343_vm0, %v566_v55, %v569_v58 }
  0x3a   : > { %572 = vst [vmem:[%s316_s16] sm:$0xff] %v570_v59  ;;  %p959_p13 = pnand %p958_p10, %p954_p6 }
  0xa0   : > { %v328_v9 = vpop.permute.xlu0 %327 }
  0xb4   : > { %v369_v11 = vpop.f32.mrf.mxu0  ;;  %v389_v12 = vpop.f32.mrf.mxu1 }
  0xb5   : > { %v1199_v13 = vadd.f32 %v369_v11, %v328_v9  ;;  %v1201_v14 = vadd.f32 %v389_v12, %v328_v9 }
  0xb7   : > { %v434_v16 = vsel %vm343_vm0, %v1199_v13, -inf  ;;  %v441_v17 = vsel %vm343_vm0, %v1201_v14, -inf }
  0xb8   : > { %v435_v19 = vrot.slane %v434_v16, 4  ;;  %v442_v20 = vrot.slane %v441_v17, 4 }
  0xba   : > { %v436_v25 = vmax.f32 %v434_v16, %v435_v19  ;;  %v443_v26 = vmax.f32 %v441_v17, %v442_v20 }
  0xbb   : > { %v409_v27 = vpop.f32.mrf.mxu2  ;;  %v429_v28 = vpop.f32.mrf.mxu3 }
  0xbc   : > { %v437_v32 = vrot.slane %v436_v25, 2  ;;  %v444_v33 = vrot.slane %v443_v26, 2  ;;  %v1218_v34 = vadd.f32 %v409_v27, %v328_v9  ;;  %v1220_v35 = vadd.f32 %v429_v28, %v328_v9 }
  0xbe   : > { %v438_v39 = vmax.f32 %v436_v25, %v437_v32  ;;  %v445_v40 = vmax.f32 %v443_v26, %v444_v33  ;;  %v448_v41 = vsel %vm343_vm0, %v1218_v34, -inf  ;;  %v455_v42 = vsel %vm343_vm0, %v1220_v35, -inf }
  0xbf   : > { %v449_v43 = vrot.slane %v448_v41, 4  ;;  %v456_v44 = vrot.slane %v455_v42, 4 }
  0xc0   : > { %v439_v46 = vrot.slane %v438_v39, 1  ;;  %v446_v47 = vrot.slane %v445_v40, 1 }
  0xc1   : > { %v450_v49 = vmax.f32 %v448_v41, %v449_v43  ;;  %v457_v50 = vmax.f32 %v455_v42, %v456_v44 }
  0xc2   : > { %v440_v53 = vmax.f32 %v438_v39, %v439_v46  ;;  %v447_v54 = vmax.f32 %v445_v40, %v446_v47 }
  0xc3   : > { %v451_v56 = vrot.slane %v450_v49, 2  ;;  %v458_v57 = vrot.slane %v457_v50, 2 }
  0xc4   : > { %vm462_vm8 = vcmp.eq.f32.partialorder %v1199_v13, %v440_v53  ;;  %vm463_vm9 = vcmp.eq.f32.partialorder %v1201_v14, %v447_v54 }
  0xc5   : > { %v466_v60 = vsel %vm462_vm8, %v1203_v15, 4  ;;  %v467_v61 = vsel %vm463_vm9, %v1203_v15, 4  ;;  %v452_v62 = vmax.f32 %v450_v49, %v451_v56  ;;  %v459_v63 = vmax.f32 %v457_v50, %v458_v57 }
  0xc6   : > { %v470_v0 = vsel %vm343_vm0, %v466_v60, 2147483647  ;;  %v480_v1 = vsel %vm343_vm0, %v467_v61, 2147483647 }
  0xc7   : > { %962 = shalt.err (!%p959_p13)
}
  0xc8   : > { %805 = dma.vmem_to_hbm [thread:$0]  (%p1138_p9), %s612_s17, 128, %s614_s25, %s579_s9   ;;  %v471_v2 = vrot.slane %v470_v0, 4  ;;  %v481_v3 = vrot.slane %v480_v1, 4  ;;  %v453_v4 = vrot.slane %v452_v62, 1  ;;  %v460_v5 = vrot.slane %v459_v63, 1 }
  0xc9   : > { %s592_s16 = scalar_lea.hbm %s1317_s4, %s798_s13  ;;  %s309_s17 = scalar_lea.vmem [#allocation7], %s771_s30 }
  0xca   : > { %vm472_vm10 = vcmp.lt.s32.totalorder %v470_v0, %v471_v2  ;;  %vm482_vm11 = vcmp.lt.s32.totalorder %v480_v1, %v481_v3  ;;  %v454_v6 = vmax.f32 %v452_v62, %v453_v4  ;;  %v461_v7 = vmax.f32 %v459_v63, %v460_v5  ;;  %s594_s25 = sshll.u32 %s309_s17, 4  ;;  %s596_s9 = sshll.u32 %s592_s16, 4  ;;  %s595_s25 = int_to_ptr.vmem [resolvable:$true] %s594_s25  ;;  %s597_s9 = int_to_ptr.hbm [resolvable:$true] %s596_s9 }
  0xcb   : > { %v473_v8 = vsel %vm472_vm10, %v470_v0, %v471_v2  ;;  %v483_v9 = vsel %vm482_vm11, %v480_v1, %v481_v3  ;;  %s574_s21 = scalar_lea.sflag [#allocation4], %s1173_s0  ;;  %s977_s13 = sshra.s32 %s597_s9, 4  ;;  %s978_s13 = int_to_ptr.hbm [resolvable:$true] %s977_s13 }
  0xcc   : > { %v474_v10 = vrot.slane %v473_v8, 2  ;;  %v484_v11 = vrot.slane %v483_v9, 2  ;;  %vm464_vm12 = vcmp.eq.f32.partialorder %v1218_v34, %v454_v6  ;;  %vm465_vm13 = vcmp.eq.f32.partialorder %v1220_v35, %v461_v7  ;;  %s979_s24 = scalar_lea.hbm %s978_s13, 8  ;;  %s983_s29 = scalar_lea.hbm %s1317_s4, 16 }
  0xcd   : > { %v468_v12 = vsel %vm464_vm12, %v1203_v15, 4  ;;  %v469_v13 = vsel %vm465_vm13, %v1203_v15, 4  ;;  %p980_p0 = scmp.ne.s32.totalorder %s978_s13, %s979_s24  ;;  %p984_p3 = scmp.lt.s32.totalorder %s978_s13, %s1317_s4 }
  0xce   : > { %vm475_vm14 = vcmp.lt.s32.totalorder %v473_v8, %v474_v10  ;;  %vm485_vm15 = vcmp.lt.s32.totalorder %v483_v9, %v484_v11  ;;  %v490_v14 = vsel %vm343_vm0, %v468_v12, 2147483647  ;;  %v500_v16 = vsel %vm343_vm0, %v469_v13, 2147483647  ;;  %p985_p4 = scmp.lt.s32.totalorder %s983_s29, %s979_s24 }
  0xcf   : > { %v476_v17 = vsel %vm475_vm14, %v473_v8, %v474_v10  ;;  %v486_v18 = vsel %vm485_vm15, %v483_v9, %v484_v11  ;;  %v491_v19 = vrot.slane %v490_v14, 4  ;;  %v501_v20 = vrot.slane %v500_v16, 4  ;;  %p981_p1 = pnand %p980_p0, %p1138_p9 }
  0xd0   : > { %v477_v21 = vrot.slane %v476_v17, 1  ;;  %v487_v22 = vrot.slane %v486_v18, 1  ;;  %p986_p5 = por %p985_p4, %p984_p3 }
  0xd1   : > { %vm492_vm1 = vcmp.lt.s32.totalorder %v490_v14, %v491_v19  ;;  %vm502_vm2 = vcmp.lt.s32.totalorder %v500_v16, %v501_v20  ;;  %p982_p2 = pneg %p981_p1 }
  0xd2   : > { %vm478_vm3 = vcmp.lt.s32.totalorder %v476_v17, %v477_v21  ;;  %vm488_vm4 = vcmp.lt.s32.totalorder %v486_v18, %v487_v22  ;;  %v493_v23 = vsel %vm492_vm1, %v490_v14, %v491_v19  ;;  %v503_v24 = vsel %vm502_vm2, %v500_v16, %v501_v20 }
  0xd3   : > { %v479_v25 = vsel %vm478_vm3, %v476_v17, %v477_v21  ;;  %v489_v26 = vsel %vm488_vm4, %v486_v18, %v487_v22  ;;  %v494_v27 = vrot.slane %v493_v23, 2  ;;  %v504_v28 = vrot.slane %v503_v24, 2  ;;  %p987_p6 = pnand %p986_p5, %p982_p2 }
  0xd4   : > { %vm510_vm5 = vcmp.eq.s32.totalorder %v1203_v15, %v479_v25  ;;  %vm511_vm8 = vcmp.eq.s32.totalorder %v1203_v15, %v489_v26 }
  0xd5   : > { %vm495_vm9 = vcmp.lt.s32.totalorder %v493_v23, %v494_v27  ;;  %vm505_vm10 = vcmp.lt.s32.totalorder %v503_v24, %v504_v28  ;;  %v781_v30 = vsel %vm510_vm5, 1.0, %v1056_v29  ;;  %v782_v31 = vsel %vm511_vm8, 1.0, %v1056_v29 }
  0xd6   : > { %v496_v32 = vsel %vm495_vm9, %v493_v23, %v494_v27  ;;  %v506_v33 = vsel %vm505_vm10, %v503_v24, %v504_v28  ;;  %v522_v36 = vpack.c.bf16 %v782_v31, %v781_v30 }
  0xd7   : > { %v497_v34 = vrot.slane %v496_v32, 1  ;;  %v507_v35 = vrot.slane %v506_v33, 1 }
  0xd8   : > { %v526_v42 = vrot.slane %v522_v36, 2 }
  0xd9   : > { %vm498_vm11 = vcmp.lt.s32.totalorder %v496_v32, %v497_v34  ;;  %vm508_vm12 = vcmp.lt.s32.totalorder %v506_v33, %v507_v35 }
  0xda   : > { %v499_v37 = vsel %vm498_vm11, %v496_v32, %v497_v34  ;;  %v509_v38 = vsel %vm508_vm12, %v506_v33, %v507_v35 }
  0xdb   : > { %vm512_vm13 = vcmp.eq.s32.totalorder %v1203_v15, %v499_v37  ;;  %vm513_vm14 = vcmp.eq.s32.totalorder %v1203_v15, %v509_v38  ;;  %v532_v15 = vsel %vm529_vm6, %v522_v36, %v526_v42 }
  0xdc   : > { %v783_v39 = vsel %vm512_vm13, 1.0, %v1056_v29  ;;  %v784_v40 = vsel %vm513_vm14, 1.0, %v1056_v29 }
  0xdd   : > { %v523_v41 = vpack.c.bf16 %v784_v40, %v783_v39 }
  0xdf   : > { %v527_v43 = vrot.slane %v523_v41, 4  ;;  %v528_v44 = vrot.slane %v523_v41, 6 }
  0xe1   : > { %v536_v45 = vsel %vm533_vm7, %v527_v43, %v528_v44 }
  0xe2   : > { %v537_v46 = vsel %vm343_vm0, %v532_v15, %v536_v45 }
  0xe3   : > { %539 = vst [vmem:[%s309_s17] sm:$0xff] %v537_v46 }
  0xe4   : > { %990 = shalt.err (!%p987_p6)
}
  0xe5   : > { %804 = dma.vmem_to_hbm [thread:$0]  (%p1138_p9), %s595_s25, 128, %s597_s9, %s574_s21  }
  0xe6 PF: > { %s625_s0 = sand.u32 1, %s1033_s18   ;;  %p816_p7 = pnand %p762_p12, %p1145_p11 }
  0xe7   : > { %s626_s12 = scalar_lea.sflag [#allocation4], %s625_s0 }
  0xe8   : > { %p817_p8 = pneg %p816_p7 }
  0xea   : > { %1024 = dma.done.wait (%p817_p8), %s626_s12, 128  }
  0xeb   : > { %1026 = vsyncadd (%p817_p8), %s626_s12, 4294967168  ;;  %s636_s28 = scalar_lea.sflag [#allocation9], %s625_s0 }
  0xec   : > { %1028 = dma.done.wait (%p817_p8), %s636_s28, 128  }
  0xed   : > { %1030 = vsyncadd (%p817_p8), %s636_s28, 4294967168  ;;  %s28_s23 = sadd.s32 1, %s1053_s23   ;;  %s1326_s18 = smov %s1037_s19 }
  0xee   : > { %p25_p10 = scmp.ge.s32.totalorder %s28_s23, 4   ;;  %s1327_s19 = smov %s1041_s20 }
  0xef   : > { %s1328_s20 = smov %s1143_s7  ;;  %s1329_s21 = smov %s1049_s22 }
  0xf0   : > { %s1330_s22 = smov %s1332_s26  ;;  %27 = sbr.rel (!%p25_p10) target bundleno = 12 (0xc), region = 112 }
  0xf5   :  { %642 = vsyncpa [#allocation3], 1 }
  0xf6   :  { %644 = vsyncpa [#allocation3 + $0x1], 1 }
  0xf7   :  { %645 = vsyncpa [#allocation6], 1 }
  0xf8   :  { %647 = vsyncpa [#allocation6 + $0x1], 1 }
  0xf9   :  { %648 = vsyncpa [#allocation4], 1 }
  0xfa   :  { %650 = vsyncpa [#allocation4 + $0x1], 1 }
  0xfb   :  { %651 = vsyncpa [#allocation9], 1 }
  0xfc   :  { %653 = vsyncpa [#allocation9 + $0x1], 1 }

</bundles_post_ra>
